<compile_context>
chip_gen: v5e
topology: v5e:2x2
jax: 0.10.0
libtpu: 0.0.40
codegen_flags: <defaults>
</compile_context>

<pallas_src>
import functools

import jax
import jax.numpy as jnp
from jax.experimental import pallas as pl
from jax.experimental.pallas import tpu as pltpu

LANE = 128


def _round_up(v, m):
    return ((v + m - 1) // m) * m


def _pad2d(x, rows, cols):
    return jnp.pad(x, ((0, rows - x.shape[0]), (0, cols - x.shape[1])))


def _tpu_vmem_capacity_bytes():
    try:
        cap = getattr(pltpu.get_tpu_info(), "vmem_capacity_bytes", None)
        if cap:
            return int(cap)
    except Exception:
        pass
    try:
        kind = jax.devices()[0].device_kind.lower()
    except Exception:
        kind = ""
    if "v7" in kind:
        return 64 * 1024 * 1024
    if "v5" in kind or "v6" in kind:
        return 128 * 1024 * 1024
    return 64 * 1024 * 1024  # conservative default for unknown chips


def _vmem_budget_bytes():
    # Leave headroom for compiler-internal scratch / spills.
    return min(_tpu_vmem_capacity_bytes() * 3 // 4, 100 * 1024 * 1024)


def _is_megacore():
    try:
        return "v7" in jax.devices()[0].device_kind.lower()
    except Exception:
        return False


def _pick_tm(n_pad, cap):
    tm = min(n_pad, cap)
    while n_pad % tm:
        tm -= 128
    return tm


def _resident_a_fits(n_pad, h1_pad, h2_pad, c_pad, tm, budget):
    # Conservatively assume double-buffering of every input block.
    a_bytes = 2 * n_pad * n_pad * 2
    xw1_bytes = 2 * n_pad * h1_pad * 2
    h1_scratch = n_pad * h1_pad * 2
    out_bytes = 2 * tm * c_pad * 4
    small = 2 * (h1_pad * h2_pad * 2 + h2_pad * c_pad * 2
                 + 4 * (h1_pad + h2_pad + c_pad))
    headroom = 8 * 1024 * 1024
    return a_bytes + xw1_bytes + h1_scratch + out_bytes + small + headroom <= budget


# ----------------------------- fused single-call path ------------------------

def _fused_gcn_kernel(a_ref, xw1_ref, b1_ref, w2_ref, b2_ref, wc_ref, bc_ref,
                      out_ref, h1_ref, *, tm, a_resident):
    phase = pl.program_id(0)          # 0: GCN layer 1, 1: GCN layer 2 + classifier
    tile = pl.program_id(1)           # node-row tile
    row0 = pl.multiple_of(tile * tm, tm)

    # ---- phase 0: H1[tile] = relu(A_hat[tile] @ XW1 + b1) -> VMEM scratch.
    # Padded rows of H1 become relu(b1); this is harmless because A_hat's padded
    # columns are zero, so padded rows never contribute to phase 1.
    @pl.when(phase == 0)
    def _():
        a_tile = a_ref[pl.ds(row0, tm), :] if a_resident else a_ref[...]
        h = jnp.dot(a_tile, xw1_ref[...], preferred_element_type=jnp.float32)
        h = jnp.maximum(h + b1_ref[...], 0.0)
        h1_ref[pl.ds(row0, tm), :] = h.astype(h1_ref.dtype)
        # NOTE: out_ref intentionally untouched in phase 0 (out index_map maps
        # every phase-0 step to block 0, which phase 1 rewrites before any
        # writeback) -> no wasted zero-fill / output HBM traffic.

    # ---- phase 1: out[tile] = relu((A_hat[tile] @ H1) @ W2 + b2) @ Wc + bc
    @pl.when(phase == 1)
    def _():
        a_tile = a_ref[pl.ds(row0, tm), :] if a_resident else a_ref[...]
        ah1 = jnp.dot(a_tile, h1_ref[...], preferred_element_type=jnp.float32)
        h2 = jnp.dot(ah1.astype(w2_ref.dtype), w2_ref[...],
                     preferred_element_type=jnp.float32)
        h2 = jnp.maximum(h2 + b2_ref[...], 0.0)
        logits = jnp.dot(h2.astype(wc_ref.dtype), wc_ref[...],
                         preferred_element_type=jnp.float32) + bc_ref[...]
        out_ref[...] = logits.astype(out_ref.dtype)


def gcn_forward_fused(a_hat, xw1, b1, w2, b2, wc, bc, *, tm, vmem_limit,
                      a_resident=None):
    """Single fused pallas_call.  a_hat: (Np,Np) bf16, xw1: (Np,H1p) bf16,
    weights bf16, biases (1,*) f32; all dims already padded to 128 multiples."""
    n_pad = a_hat.shape[0]
    h1_pad = xw1.shape[1]
    h2_pad = w2.shape[1]
    c_pad = wc.shape[1]
    assert n_pad % tm == 0 and tm % 16 == 0
    num_tiles = n_pad // tm

    if a_resident is None:
        a_resident = _resident_a_fits(n_pad, h1_pad, h2_pad, c_pad, tm, vmem_limit)

    if a_resident:
        a_spec = pl.BlockSpec((n_pad, n_pad), lambda p, i: (0, 0))  # resident, read once
    else:
        a_spec = pl.BlockSpec((tm, n_pad), lambda p, i: (i, 0))     # streamed per phase

    def resident(r, c):
        return pl.BlockSpec((r, c), lambda p, i: (0, 0))

    flops = 2 * (2 * n_pad * n_pad * h1_pad        # A @ XW1 (phase 0) + A @ H1 (phase 1)
                 + n_pad * h1_pad * h2_pad         # (A @ H1) @ W2
                 + n_pad * h2_pad * c_pad)         # H2 @ Wc
    bytes_accessed = ((1 if a_resident else 2) * n_pad * n_pad * 2
                      + n_pad * h1_pad * 2
                      + (h1_pad * h2_pad + h2_pad * c_pad) * 2
                      + (h1_pad + h2_pad + c_pad) * 4
                      + n_pad * c_pad * 4)

    return pl.pallas_call(
        functools.partial(_fused_gcn_kernel, tm=tm, a_resident=a_resident),
        out_shape=jax.ShapeDtypeStruct((n_pad, c_pad), jnp.float32),
        grid_spec=pltpu.PrefetchScalarGridSpec(
            num_scalar_prefetch=0,
            grid=(2, num_tiles),
            in_specs=[
                a_spec,                           # A_hat (resident or streamed)
                resident(n_pad, h1_pad),          # XW1 (precomputed outside)
                resident(1, h1_pad),              # b1
                resident(h1_pad, h2_pad),         # W2
                resident(1, h2_pad),              # b2
                resident(h2_pad, c_pad),          # Wc
                resident(1, c_pad),               # bc
            ],
            # Phase 0 collapses to block 0 (never written); only phase 1 writes.
            out_specs=pl.BlockSpec((tm, c_pad), lambda p, i: (i * p, 0)),
            scratch_shapes=[
                pltpu.VMEM((n_pad, h1_pad), jnp.bfloat16),   # H1 carried across phases
            ]),
        compiler_params=pltpu.CompilerParams(
            # H1 scratch is carried across the phase boundary -> must stay on
            # one TensorCore; use the two-call split path for megacore chips.
            dimension_semantics=("arbitrary", "arbitrary"),
            vmem_limit_bytes=vmem_limit),
        cost_estimate=pl.CostEstimate(
            flops=flops, transcendentals=0, bytes_accessed=bytes_accessed),
    )(a_hat, xw1, b1, w2, b2, wc, bc)


# ----------------------------- two-call split path (megacore) ----------------

def _gcn_layer1_kernel(a_ref, xw1_ref, b1_ref, h1_ref):
    h = jnp.dot(a_ref[...], xw1_ref[...], preferred_element_type=jnp.float32)
    h1_ref[...] = jnp.maximum(h + b1_ref[...], 0.0).astype(h1_ref.dtype)


def _gcn_layer2_kernel(a_ref, h1_ref, w2_ref, b2_ref, wc_ref, bc_ref, out_ref):
    ah1 = jnp.dot(a_ref[...], h1_ref[...], preferred_element_type=jnp.float32)
    h2 = jnp.dot(ah1.astype(w2_ref.dtype), w2_ref[...],
                 preferred_element_type=jnp.float32)
    h2 = jnp.maximum(h2 + b2_ref[...], 0.0)
    logits = jnp.dot(h2.astype(wc_ref.dtype), wc_ref[...],
                     preferred_element_type=jnp.float32) + bc_ref[...]
    out_ref[...] = logits.astype(out_ref.dtype)


def gcn_forward_split(a_hat, xw1, b1, w2, b2, wc, bc, *, tm, vmem_limit):
    """Two pallas_calls with a 'parallel' row-tile axis so v7x's two TensorCores
    each stream their own A row tiles; H1 round-trips HBM in bf16 (cheap)."""
    n_pad = a_hat.shape[0]
    h1_pad = xw1.shape[1]
    h2_pad = w2.shape[1]
    c_pad = wc.shape[1]
    assert n_pad % tm == 0 and tm % 16 == 0
    num_tiles = n_pad // tm

    def resident(r, c):
        return pl.BlockSpec((r, c), lambda i: (0, 0))

    h1 = pl.pallas_call(
        _gcn_layer1_kernel,
        out_shape=jax.ShapeDtypeStruct((n_pad, h1_pad), jnp.bfloat16),
        grid_spec=pltpu.PrefetchScalarGridSpec(
            num_scalar_prefetch=0,
            grid=(num_tiles,),
            in_specs=[pl.BlockSpec((tm, n_pad), lambda i: (i, 0)),   # A row tile
                      resident(n_pad, h1_pad),                       # XW1
                      resident(1, h1_pad)],                          # b1
            out_specs=pl.BlockSpec((tm, h1_pad), lambda i: (i, 0))),
        compiler_params=pltpu.CompilerParams(
            dimension_semantics=("parallel",),
            vmem_limit_bytes=vmem_limit),
    )(a_hat, xw1, b1)

    out = pl.pallas_call(
        _gcn_layer2_kernel,
        out_shape=jax.ShapeDtypeStruct((n_pad, c_pad), jnp.float32),
        grid_spec=pltpu.PrefetchScalarGridSpec(
            num_scalar_prefetch=0,
            grid=(num_tiles,),
            in_specs=[pl.BlockSpec((tm, n_pad), lambda i: (i, 0)),   # A row tile
                      resident(n_pad, h1_pad),                       # H1
                      resident(h1_pad, h2_pad),                      # W2
                      resident(1, h2_pad),                           # b2
                      resident(h2_pad, c_pad),                       # Wc
                      resident(1, c_pad)],                           # bc
            out_specs=pl.BlockSpec((tm, c_pad), lambda i: (i, 0))),
        compiler_params=pltpu.CompilerParams(
            dimension_semantics=("parallel",),
            vmem_limit_bytes=vmem_limit),
    )(a_hat, h1, w2, b2, wc, bc)
    return out


# ----------------------------- model glue ------------------------------------

def build_normalized_adjacency(edge_index, num_nodes):
    """Dense A_hat = D^{-1/2} (A + I) D^{-1/2}.  Duplicate edges accumulate
    (scatter-add), matching PyG GCNConv; messages flow src -> dst."""
    src, dst = edge_index[0], edge_index[1]
    a = jnp.zeros((num_nodes, num_nodes), jnp.float32)
    a = a.at[dst, src].add(1.0)
    a = a + jnp.eye(num_nodes, dtype=jnp.float32)       # self-loops
    deg = jnp.sum(a, axis=1)
    d_inv_sqrt = jnp.where(deg > 0, 1.0 / jnp.sqrt(deg), 0.0)
    return a * d_inv_sqrt[:, None] * d_inv_sqrt[None, :]


def prepare_graph(edge_index, num_nodes):
    """Build the padded bf16 A_hat ONCE per static graph (O(N^2) f32 work +
    cast hoisted out of the per-forward path) and reuse it across forwards."""
    a_hat = build_normalized_adjacency(edge_index, num_nodes)
    n_pad = _round_up(num_nodes, LANE)
    return _pad2d(a_hat, n_pad, n_pad).astype(jnp.bfloat16)


def gcn_model_forward(params, x, a_hat_pad, *, tm=None, mode="auto",
                      a_resident=None):
    """Forward pass equivalent to GCNModel.forward (inference: dropout = identity).
    a_hat_pad comes from prepare_graph() so the adjacency is built/cast once."""
    n, f = x.shape
    h1 = params["w1"].shape[1]
    h2 = params["w2"].shape[1]
    c = params["wc"].shape[1]

    n_pad = a_hat_pad.shape[0]
    assert n_pad == _round_up(n, LANE)
    f_pad = _round_up(f, LANE)
    h1_pad = _round_up(h1, LANE)
    h2_pad = _round_up(h2, LANE)
    c_pad = _round_up(c, LANE)

    bf = jnp.bfloat16
    x_p = _pad2d(x, n_pad, f_pad).astype(bf)
    w1_p = _pad2d(params["w1"], f_pad, h1_pad).astype(bf)
    # XW1 precomputed OUTSIDE the kernel (tiny XLA matmul): frees N-scaled VMEM
    # and removes the serialized tile-0 hoist at phase start.
    xw1 = jnp.dot(x_p, w1_p, preferred_element_type=jnp.float32).astype(bf)

    w2_p = _pad2d(params["w2"], h1_pad, h2_pad).astype(bf)
    wc_p = _pad2d(params["wc"], h2_pad, c_pad).astype(bf)
    b1_p = jnp.pad(params["b1"], (0, h1_pad - h1)).reshape(1, -1).astype(jnp.float32)
    b2_p = jnp.pad(params["b2"], (0, h2_pad - h2)).reshape(1, -1).astype(jnp.float32)
    bc_p = jnp.pad(params["bc"], (0, c_pad - c)).reshape(1, -1).astype(jnp.float32)

    budget = _vmem_budget_bytes()
    if tm is None:
        tm = _pick_tm(n_pad, 1024 if budget >= 80 * 1024 * 1024 else 512)

    if mode == "auto":
        # v7x has two TensorCores: split into two calls with a parallel row axis.
        mode = "split" if _is_megacore() else "fused"

    if mode == "split":
        out_pad = gcn_forward_split(a_hat_pad, xw1, b1_p, w2_p, b2_p, wc_p, bc_p,
                                    tm=tm, vmem_limit=budget)
    else:
        out_pad = gcn_forward_fused(a_hat_pad, xw1, b1_p, w2_p, b2_p, wc_p, bc_p,
                                    tm=tm, vmem_limit=budget, a_resident=a_resident)
    return out_pad[:n, :c]


def init_params(key, num_features, hidden1, hidden2, num_classes):
    k1, k2, k3 = jax.random.split(key, 3)
    s1 = 1.0 / jnp.sqrt(num_features)
    s2 = 1.0 / jnp.sqrt(hidden1)
    s3 = 1.0 / jnp.sqrt(hidden2)
    return {
        "w1": jax.random.uniform(k1, (num_features, hidden1), jnp.float32, -s1, s1),
        "b1": jnp.zeros((hidden1,), jnp.float32),
        "w2": jax.random.uniform(k2, (hidden1, hidden2), jnp.float32, -s2, s2),
        "b2": jnp.zeros((hidden2,), jnp.float32),
        "wc": jax.random.uniform(k3, (hidden2, num_classes), jnp.float32, -s3, s3),
        "bc": jnp.zeros((num_classes,), jnp.float32),
    }


# --------------------------------- main ---------------------------------------

if __name__ == "__main__":
    num_nodes = 64
    num_features = 16
    hidden1 = 32
    hidden2 = 32
    num_classes = 8
    num_edges = 256

    key = jax.random.PRNGKey(0)
    k_x, k_e, k_p = jax.random.split(key, 3)

    x = jax.random.normal(k_x, (num_nodes, num_features), jnp.float32)
    edge_index = jax.random.randint(k_e, (2, num_edges), 0, num_nodes, dtype=jnp.int32)
    params = init_params(k_p, num_features, hidden1, hidden2, num_classes)

    # A_hat built once (static graph) and reused by every forward below.
    a_hat_pad = prepare_graph(edge_index, num_nodes)

    tm = 64  # 2 row tiles -> exercises multi-tile + dynamic-slice paths
    out_fused = jax.block_until_ready(
        gcn_model_forward(params, x, a_hat_pad, tm=tm, mode="fused"))           # A resident
    out_stream = jax.block_until_ready(
        gcn_model_forward(params, x, a_hat_pad, tm=tm, mode="fused",
                          a_resident=False))                                    # A streamed
    out_split = jax.block_until_ready(
        gcn_model_forward(params, x, a_hat_pad, tm=tm, mode="split"))           # 2-call / megacore

    assert out_fused.shape == (num_nodes, num_classes)

    # Pure-JAX reference with the same bf16-MXU / f32-accumulate precision path
    # (XW1 precompute, bf16 H1, layer-2 re-association) as the kernels.
    a_hat = build_normalized_adjacency(edge_index, num_nodes)
    bf = jnp.bfloat16
    mm = lambda a, b: jnp.dot(a.astype(bf), b.astype(bf),
                              preferred_element_type=jnp.float32)
    xw1_ref = mm(x, params["w1"])
    h1_ref = jnp.maximum(mm(a_hat, xw1_ref) + params["b1"], 0.0)
    ah1_ref = mm(a_hat, h1_ref)
    h2_ref = jnp.maximum(mm(ah1_ref, params["w2"]) + params["b2"], 0.0)
    out_ref = mm(h2_ref, params["wc"]) + params["bc"]

    for name, o in (("fused", out_fused), ("stream", out_stream), ("split", out_split)):
        max_err = float(jnp.max(jnp.abs(o - out_ref)))
        assert jnp.allclose(o, out_ref, atol=1e-2, rtol=1e-2), (name, max_err)

    print("KERNEL_OK")
</pallas_src>

<mosaic_0001>
module attributes {stable_mosaic.version = 11 : i64} {
  func.func @_fused_gcn_kernel(%arg0: i32, %arg1: i32, %arg2: memref<128x128xbf16, #tpu.memory_space<vmem>>, %arg3: memref<128x128xbf16, #tpu.memory_space<vmem>>, %arg4: memref<1x128xf32, #tpu.memory_space<vmem>>, %arg5: memref<128x128xbf16, #tpu.memory_space<vmem>>, %arg6: memref<1x128xf32, #tpu.memory_space<vmem>>, %arg7: memref<128x128xbf16, #tpu.memory_space<vmem>>, %arg8: memref<1x128xf32, #tpu.memory_space<vmem>>, %arg9: memref<64x128xf32, #tpu.memory_space<vmem>>, %arg10: memref<128x128xbf16, #tpu.memory_space<vmem>>) attributes {dimension_semantics = [#tpu.dimension_semantics<arbitrary>, #tpu.dimension_semantics<arbitrary>], iteration_bounds = array<i64: 2, 2>, scalar_prefetch = 0 : i64, scratch_operands = 1 : i64, tpu.core_type = #tpu.core_type<tc>, window_params = [{pipeline_mode = #tpu.pipeline_mode<synchronous>, transform_indices = @transform_0, window_bounds = array<i64: 128, 128>}, {pipeline_mode = #tpu.pipeline_mode<synchronous>, transform_indices = @transform_1, window_bounds = array<i64: 128, 128>}, {pipeline_mode = #tpu.pipeline_mode<synchronous>, transform_indices = @transform_2, window_bounds = array<i64: 1, 128>}, {pipeline_mode = #tpu.pipeline_mode<synchronous>, transform_indices = @transform_3, window_bounds = array<i64: 128, 128>}, {pipeline_mode = #tpu.pipeline_mode<synchronous>, transform_indices = @transform_4, window_bounds = array<i64: 1, 128>}, {pipeline_mode = #tpu.pipeline_mode<synchronous>, transform_indices = @transform_5, window_bounds = array<i64: 128, 128>}, {pipeline_mode = #tpu.pipeline_mode<synchronous>, transform_indices = @transform_6, window_bounds = array<i64: 1, 128>}, {transform_indices = @transform_7, window_bounds = array<i64: 64, 128>}]} {
    %c64_i32 = arith.constant 64 : i32
    %0 = arith.muli %arg1, %c64_i32 : i32
    %1 = tpu.assume_multiple %0, 64 : i32
    %c0_i32 = arith.constant 0 : i32
    %2 = arith.cmpi eq, %arg0, %c0_i32 : i32
    %3 = arith.extui %2 : i1 to i32
    %c0_i32_0 = arith.constant 0 : i32
    %4 = arith.cmpi ne, %3, %c0_i32_0 : i32
    scf.if %4 {
      %8 = arith.index_cast %1 : i32 to index
      %c0 = arith.constant 0 : index
      %9 = vector.load %arg2[%8, %c0] : memref<128x128xbf16, #tpu.memory_space<vmem>>, vector<64x128xbf16>
      %c0_2 = arith.constant 0 : index
      %c0_3 = arith.constant 0 : index
      %10 = vector.load %arg3[%c0_2, %c0_3] : memref<128x128xbf16, #tpu.memory_space<vmem>>, vector<128x128xbf16>
      %cst = arith.constant dense<0.000000e+00> : vector<64x128xf32>
      %11 = tpu.matmul %9, %10, %cst {dimension_numbers = #tpu.dot_dimension_numbers<[1], [0], [0], [1], [0, 0, 1, 1], [], []>} : vector<64x128xbf16>, vector<128x128xbf16>, vector<64x128xf32> -> vector<64x128xf32>
      %c0_4 = arith.constant 0 : index
      %c0_5 = arith.constant 0 : index
      %12 = vector.load %arg4[%c0_4, %c0_5] : memref<1x128xf32, #tpu.memory_space<vmem>>, vector<1x128xf32>
      %13 = vector.broadcast %12 : vector<1x128xf32> to vector<64x128xf32>
      %14 = arith.addf %11, %13 : vector<64x128xf32>
      %cst_6 = arith.constant 0.000000e+00 : f32
      %15 = vector.broadcast %cst_6 : f32 to vector<64x128xf32>
      %16 = arith.maximumf %14, %15 : vector<64x128xf32>
      %17 = arith.truncf %16 : vector<64x128xf32> to vector<64x128xbf16>
      %18 = arith.index_cast %1 : i32 to index
      %c0_7 = arith.constant 0 : index
      %19 = vector.load %arg10[%18, %c0_7] : memref<128x128xbf16, #tpu.memory_space<vmem>>, vector<64x128xbf16>
      tpu.vector_store %arg10[%18, %c0_7], %17 {strides = array<i32>} : memref<128x128xbf16, #tpu.memory_space<vmem>>, vector<64x128xbf16>,
    } else {
    }
    %c1_i32 = arith.constant 1 : i32
    %5 = arith.cmpi eq, %arg0, %c1_i32 : i32
    %6 = arith.extui %5 : i1 to i32
    %c0_i32_1 = arith.constant 0 : i32
    %7 = arith.cmpi ne, %6, %c0_i32_1 : i32
    scf.if %7 {
      %8 = arith.index_cast %1 : i32 to index
      %c0 = arith.constant 0 : index
      %9 = vector.load %arg2[%8, %c0] : memref<128x128xbf16, #tpu.memory_space<vmem>>, vector<64x128xbf16>
      %c0_2 = arith.constant 0 : index
      %c0_3 = arith.constant 0 : index
      %10 = vector.load %arg10[%c0_2, %c0_3] : memref<128x128xbf16, #tpu.memory_space<vmem>>, vector<128x128xbf16>
      %cst = arith.constant dense<0.000000e+00> : vector<64x128xf32>
      %11 = tpu.matmul %9, %10, %cst {dimension_numbers = #tpu.dot_dimension_numbers<[1], [0], [0], [1], [0, 0, 1, 1], [], []>} : vector<64x128xbf16>, vector<128x128xbf16>, vector<64x128xf32> -> vector<64x128xf32>
      %12 = arith.truncf %11 : vector<64x128xf32> to vector<64x128xbf16>
      %c0_4 = arith.constant 0 : index
      %c0_5 = arith.constant 0 : index
      %13 = vector.load %arg5[%c0_4, %c0_5] : memref<128x128xbf16, #tpu.memory_space<vmem>>, vector<128x128xbf16>
      %cst_6 = arith.constant dense<0.000000e+00> : vector<64x128xf32>
      %14 = tpu.matmul %12, %13, %cst_6 {dimension_numbers = #tpu.dot_dimension_numbers<[1], [0], [0], [1], [0, 0, 1, 1], [], []>} : vector<64x128xbf16>, vector<128x128xbf16>, vector<64x128xf32> -> vector<64x128xf32>
      %c0_7 = arith.constant 0 : index
      %c0_8 = arith.constant 0 : index
      %15 = vector.load %arg6[%c0_7, %c0_8] : memref<1x128xf32, #tpu.memory_space<vmem>>, vector<1x128xf32>
      %16 = vector.broadcast %15 : vector<1x128xf32> to vector<64x128xf32>
      %17 = arith.addf %14, %16 : vector<64x128xf32>
      %cst_9 = arith.constant 0.000000e+00 : f32
      %18 = vector.broadcast %cst_9 : f32 to vector<64x128xf32>
      %19 = arith.maximumf %17, %18 : vector<64x128xf32>
      %20 = arith.truncf %19 : vector<64x128xf32> to vector<64x128xbf16>
      %c0_10 = arith.constant 0 : index
      %c0_11 = arith.constant 0 : index
      %21 = vector.load %arg7[%c0_10, %c0_11] : memref<128x128xbf16, #tpu.memory_space<vmem>>, vector<128x128xbf16>
      %cst_12 = arith.constant dense<0.000000e+00> : vector<64x128xf32>
      %22 = tpu.matmul %20, %21, %cst_12 {dimension_numbers = #tpu.dot_dimension_numbers<[1], [0], [0], [1], [0, 0, 1, 1], [], []>} : vector<64x128xbf16>, vector<128x128xbf16>, vector<64x128xf32> -> vector<64x128xf32>
      %c0_13 = arith.constant 0 : index
      %c0_14 = arith.constant 0 : index
      %23 = vector.load %arg8[%c0_13, %c0_14] : memref<1x128xf32, #tpu.memory_space<vmem>>, vector<1x128xf32>
      %24 = vector.broadcast %23 : vector<1x128xf32> to vector<64x128xf32>
      %25 = arith.addf %22, %24 : vector<64x128xf32>
      %c0_15 = arith.constant 0 : index
      %c0_16 = arith.constant 0 : index
      %26 = vector.load %arg9[%c0_15, %c0_16] : memref<64x128xf32, #tpu.memory_space<vmem>>, vector<64x128xf32>
      tpu.vector_store %arg9[%c0_15, %c0_16], %25 {strides = array<i32>} : memref<64x128xf32, #tpu.memory_space<vmem>>, vector<64x128xf32>,
    } else {
    }
    return
  }
  func.func @transform_0(%arg0: i32, %arg1: i32) -> (i32, i32) {
    %c0_i32 = arith.constant 0 : i32
    %c0_i32_0 = arith.constant 0 : i32
    %c0_i32_1 = arith.constant 0 : i32
    return %c0_i32, %c0_i32_0 : i32, i32
  }
  func.func @transform_1(%arg0: i32, %arg1: i32) -> (i32, i32) {
    %c0_i32 = arith.constant 0 : i32
    %c0_i32_0 = arith.constant 0 : i32
    %c0_i32_1 = arith.constant 0 : i32
    return %c0_i32, %c0_i32_0 : i32, i32
  }
  func.func @transform_2(%arg0: i32, %arg1: i32) -> (i32, i32) {
    %c0_i32 = arith.constant 0 : i32
    %c0_i32_0 = arith.constant 0 : i32
    %c0_i32_1 = arith.constant 0 : i32
    return %c0_i32, %c0_i32_0 : i32, i32
  }
  func.func @transform_3(%arg0: i32, %arg1: i32) -> (i32, i32) {
    %c0_i32 = arith.constant 0 : i32
    %c0_i32_0 = arith.constant 0 : i32
    %c0_i32_1 = arith.constant 0 : i32
    return %c0_i32, %c0_i32_0 : i32, i32
  }
  func.func @transform_4(%arg0: i32, %arg1: i32) -> (i32, i32) {
    %c0_i32 = arith.constant 0 : i32
    %c0_i32_0 = arith.constant 0 : i32
    %c0_i32_1 = arith.constant 0 : i32
    return %c0_i32, %c0_i32_0 : i32, i32
  }
  func.func @transform_5(%arg0: i32, %arg1: i32) -> (i32, i32) {
    %c0_i32 = arith.constant 0 : i32
    %c0_i32_0 = arith.constant 0 : i32
    %c0_i32_1 = arith.constant 0 : i32
    return %c0_i32, %c0_i32_0 : i32, i32
  }
  func.func @transform_6(%arg0: i32, %arg1: i32) -> (i32, i32) {
    %c0_i32 = arith.constant 0 : i32
    %c0_i32_0 = arith.constant 0 : i32
    %c0_i32_1 = arith.constant 0 : i32
    return %c0_i32, %c0_i32_0 : i32, i32
  }
  func.func @transform_7(%arg0: i32, %arg1: i32) -> (i32, i32) {
    %0 = arith.muli %arg1, %arg0 : i32
    %c0_i32 = arith.constant 0 : i32
    %c0_i32_0 = arith.constant 0 : i32
    return %0, %c0_i32 : i32, i32
  }
}

</mosaic_0001>

<bundles_post_ra>
// kernel: tpu_custom_call.1
= control target key start
LH: loop header
LB: loop body
LE: loop exit
PB: predicated region body
PF: predicated region fallthrough
CT: control target
= control target key end

     0   :  { %s1858_s0 = inlined_call_operand.hbm [shape: bf16[128,128], index: 0, kind: input, shape index: {}]   ;;  %s1859_s1 = inlined_call_operand.hbm [shape: bf16[128,128], index: 1, kind: input, shape index: {}]   ;;  %s1860_s2 = inlined_call_operand.vmem [shape: f32[1,128], index: 2, kind: input, shape index: {}]   ;;  %s1861_s3 = inlined_call_operand.hbm [shape: bf16[128,128], index: 3, kind: input, shape index: {}]   ;;  %s1862_s4 = inlined_call_operand.vmem [shape: f32[1,128], index: 4, kind: input, shape index: {}]   ;;  %s1863_s5 = inlined_call_operand.hbm [shape: bf16[128,128], index: 5, kind: input, shape index: {}]   ;;  %s1864_s6 = inlined_call_operand.vmem [shape: f32[1,128], index: 6, kind: input, shape index: {}]   ;;  %s1865_s7 = inlined_call_operand.hbm [shape: f32[128,128], index: 7, kind: output, shape index: {}]  }
   0x1   :  { %1872 = sst [smem:[#allocation23_spill]] %s1859_s1 }
   0x2   :  { %12 = vsyncpa [#allocation4], 0 }
   0x3   :  { %13 = vsyncpa [#allocation7], 0 }
   0x4   :  { %14 = vsyncpa [#allocation10], 0 }
   0x5   :  { %15 = vsyncpa [#allocation5], 0 }
   0x6   :  { %17 = vsyncpa [#allocation5 + $0x1], 0  ;;  %s1655_s24 = smov 0   ;;  %s1657_s25 = smov 0  }
   0x7   :  { %s1659_s26 = smov 0   ;;  %s1661_s27 = smov 0  }
   0x8   :  { %s1663_s28 = smov 0   ;;  %s1665_s29 = smov 0  }
   0x9   :  { %s1667_s30 = smov 0   ;;  %s1669_s8 = smov 0  }
   0xa LB: > { %1873 = sst [smem:[#allocation16_spill]] %s1585_s26  ;;  %s980_s9 = sadd.s32 4294967295, %s1605_s8   ;;  %s1605_s8 = sphi %s1669_s8, %s23_s8   ;;  %s1601_s30 = sphi %s1667_s30, %s1892_s30   ;;  %s1597_s29 = sphi %s1665_s29, %s1891_s29   ;;  %s1593_s28 = sphi %s1663_s28, %s1890_s28   ;;  %s1589_s27 = sphi %s1661_s27, %s1889_s27   ;;  %s1585_s26 = sphi %s1659_s26, %s1888_s26   ;;  %s1581_s25 = sphi %s1657_s25, %s1894_s25   ;;  %s1577_s24 = sphi %s1655_s24, %s1893_s24  }
   0xb   : > { %1874 = sst [smem:[#allocation17_spill]] %s1597_s29  ;;  %s981_s10 = sadd.s32 4294967294, %s1605_s8  }
   0xc   : > { %1875 = sst [smem:[#allocation18_spill]] %s1601_s30  ;;  %s32_s11 = sadd.s32 1, %s1597_s29 }
   0xd   : > { %s35_s12 = sadd.s32 1, %s1601_s30  ;;  %p33_p0 = scmp.ge.s32.totalorder %s32_s11, 2 }
   0xe   : > { %s186_s13 = smul.u32 %s1597_s29, %s1601_s30  ;;  %s191_s14 = sadd.s32 1, %s1585_s26 }
   0xf   : > { %p201_p1 = scmp.ne.s32.totalorder %s1585_s26, %s1581_s25  ;;  %s1896_s11 = smov (%p33_p0, %s32_s11), 0 }
  0x10   : > { %1876 = sst [smem:[#allocation19_spill]] %s1896_s11  ;;  %s1898_s12 = smov (!%p33_p0, %s35_s12), %s1601_s30 }
  0x11   : > { %p202_p2 = scmp.eq.s32.totalorder %s980_s9, 3  ;;  %p207_p3 = scmp.ne.s32.totalorder %s1581_s25, %s1577_s24 }
  0x12   : > { %p37_p4 = scmp.ge.s32.totalorder %s1898_s12, 2  ;;  %p208_p5 = scmp.eq.s32.totalorder %s981_s10, 3 }
  0x13   : > { %p1709_p6 = por %p202_p2, %p201_p1  ;;  %p982_p7 = scmp.ge.s32.totalorder %s1605_s8, 1 }
  0x14   : > { %s1900_s12 = smov (%p37_p4, %s1898_s12), 0  ;;  %p1716_p8 = por %p208_p5, %p207_p3 }
  0x15   : > { %1878 = sst [smem:[#allocation20_spill]] %s1900_s12  ;;  %p215_p9 = scmp.lt.s32.totalorder %s1605_s8, 5 }
  0x16   : > { %s1879_s16 = scalar_select %p1716_p8, 1, 0 }
  0x17   : > { %s187_s17 = smul.u32 %s1900_s12, %s1896_s11  ;;  %p1723_p10 = pnand %p982_p7, %p215_p9 }
  0x18   : > { %1880 = sst [smem:[#allocation21_spill]] %s1879_s16  ;;  %p1727_p11 = scmp.eq.s32.totalorder %s980_s9, 0 }
  0x19   : > { %s188_s20 = ssub.s32 %s186_s13, %s187_s17  ;;  %p1278_p13 = pneg %p1723_p10 }
  0x1a   : > { %p189_p12 = scmp.eq.s32.totalorder %s188_s20, 0  ;;  %s1883_s1 = sld [smem:[#allocation23_spill]] }
  0x1b   : > { %p1741_p0 = pnand %p1727_p11, %p1278_p13  ;;  %s1607_s9 = smov [#allocation6]  }
  0x1c   : > { %s1737_s10 = scalar_select %p189_p12, %s1585_s26, %s191_s14  }
  0x1d   : > { %s242_s11 = sshll.u32 %s1607_s9, 4  ;;  %s1608_s13 = smov 64   ;;  %s243_s11 = int_to_ptr.vmem [resolvable:$true] %s242_s11 }
  0x1e   : > { %1884 = sst [smem:[#allocation22_spill]] %s1737_s10  ;;  %s1609_s17 = smov 4  }
  0x1f   : > { %s226_s14 = sshll.u32 %s1858_s0, 4  ;;  %s1610_s22 = smov [#allocation3]   ;;  %s227_s14 = int_to_ptr.hbm [resolvable:$true] %s226_s14 }
  0x20   : > { %s240_s23 = sshll.u32 %s1883_s1, 4  ;;  %s228_s1 = sshll.u32 %s1610_s22, 4  ;;  %s241_s23 = int_to_ptr.hbm [resolvable:$true] %s240_s23  ;;  %s229_s1 = int_to_ptr.vmem [resolvable:$true] %s228_s1 }
  0x21   : > { %1284 = dma.hbm_to_vmem [thread:$0]  (!%p1741_p0), %s241_s23, 1024, %s243_s11, [#allocation7], %s1608_s13, %s1608_s13, %s1609_s17  }
  0x22   : > { %s257_s10 = sshll.u32 %s1861_s3, 4  ;;  %s1611_s9 = smov [#allocation8]   ;;  %s258_s10 = int_to_ptr.hbm [resolvable:$true] %s257_s10 }
  0x23   : > { %1281 = dma.hbm_to_vmem [thread:$0]  (!%p1741_p0), %s227_s14, 1024, %s229_s1, [#allocation4], %s1608_s13, %s1608_s13, %s1609_s17  }
  0x24   : > { %s259_s26 = sshll.u32 %s1611_s9, 4  ;;  %s274_s23 = sshll.u32 %s1863_s5, 4  ;;  %s260_s26 = int_to_ptr.vmem [resolvable:$true] %s259_s26  ;;  %s275_s23 = int_to_ptr.hbm [resolvable:$true] %s274_s23 }
  0x25   : > { %1287 = dma.hbm_to_vmem [thread:$0]  (!%p1741_p0), %s258_s10, 1024, %s260_s26, [#allocation7], %s1608_s13, %s1608_s13, %s1609_s17  }
  0x26   : > { %s1612_s20 = smov [#allocation9]   ;;  %295 = sbr.rel (%p1723_p10) target bundleno = 761 (0x2f9), region = 48 }
  0x27   : > { %s276_s21 = sshll.u32 %s1612_s20, 4  ;;  %s277_s21 = int_to_ptr.vmem [resolvable:$true] %s276_s21 }
  0x28   : > { %1290 = dma.hbm_to_vmem [thread:$0]  (!%p1741_p0), %s275_s23, 1024, %s277_s21, [#allocation10], %s1608_s13, %s1608_s13, %s1609_s17  }
  0x2b   : > { %1560 = dma.done.wait (%p1727_p11), [#allocation4], 1024  }
  0x2c   : > { %1562 = vsyncadd (%p1727_p11), [#allocation4], 4294966272 }
  0x2d   : > { %1564 = dma.done.wait (%p1727_p11), [#allocation7], 2048  }
  0x2e   : > { %1566 = vsyncadd (%p1727_p11), [#allocation7], 4294965248 }
  0x2f   : > { %1568 = dma.done.wait (%p1727_p11), [#allocation10], 1024  }
  0x30   : > { %1570 = vsyncadd (%p1727_p11), [#allocation10], 4294966272  ;;  %s335_s1 = sand.u32 1, %s1581_s25   ;;  %s993_s26 = sshll.u32 %s1589_s27, 6 }
  0x31   : > { %s992_s29 = sshll.u32 %s335_s1, 6  ;;  %p994_p1 = scmp.ne.s32.totalorder %s1593_s28, 0 }
  0x32   : > { %s1780_s30 = scalar_lea.vmem [#allocation11], %s992_s29  ;;  %s1785_s12 = sshra.s32 (!%p994_p1), %s993_s26, 3 }
  0x33   : > { %344 = sbr.rel (%p994_p1) target bundleno = 237 (0xed), region = 68  ;;  %s995_s16 = sshll.u32 (!%p994_p1), %s1785_s12, 2 }
  0x34   : > { %s348_s18 = scalar_lea.vmem (!%p994_p1), [#allocation3], %s995_s16  ;;  %s495_s13 = scalar_lea.vmem (!%p994_p1), [#allocation2], %s995_s16 }
  0x38   : > { %v1175_v0 = vld [vmem:[#allocation6 + $0x38] sm:$0xff]  ;;  %v1174_v1 = vld [vmem:[#allocation6 + $0x30] sm:$0xff]  ;;  %v1173_v2 = vld [vmem:[#allocation6 + $0x28] sm:$0xff] }
  0x39   : > { %449 = vmatpush.bf16.msra.mxu0 %v1175_v0  ;;  %1228 = vmatpush.bf16.msra.mxu1 %v1175_v0  ;;  %v1172_v3 = vld [vmem:[#allocation6 + $0x20] sm:$0xff]  ;;  %v1171_v4 = vld [vmem:[#allocation6 + $0x18] sm:$0xff]  ;;  %v1170_v5 = vld [vmem:[#allocation6 + $0x10] sm:$0xff] }
  0x3a   : > { %1229 = vmatpush.bf16.msra.mxu2 %v1175_v0  ;;  %1230 = vmatpush.bf16.msra.mxu3 %v1175_v0  ;;  %v1169_v6 = vld [vmem:[#allocation6 + $0x8] sm:$0xff]  ;;  %v1168_v7 = vld [vmem:[#allocation6] sm:$0xff]  ;;  %v1166_v10 = vld [vmem:[%s348_s18 + $0x10] sm:$0xff] }
  0x3b   : > { %v1164_v8 = vld [vmem:[%s348_s18] sm:$0xff]  ;;  %v1165_v9 = vld [vmem:[%s348_s18 + $0x8] sm:$0xff]  ;;  %v1167_v11 = vld [vmem:[%s348_s18 + $0x18] sm:$0xff] }
  0x3c   : > { %v1376_v14 = vld [vmem:[%s1860_s2] ss:$0 sm:$0xff] }
  0x3d   : > { %450 = vmatpush.bf16.msra.mxu0 %v1174_v1  ;;  %1231 = vmatpush.bf16.msra.mxu1 %v1174_v1 }
  0x3e   : > { %1232 = vmatpush.bf16.msra.mxu2 %v1174_v1  ;;  %1233 = vmatpush.bf16.msra.mxu3 %v1174_v1 }
  0x41   : > { %451 = vmatpush.bf16.msra.mxu0 %v1173_v2  ;;  %1234 = vmatpush.bf16.msra.mxu1 %v1173_v2 }
  0x42   : > { %1235 = vmatpush.bf16.msra.mxu2 %v1173_v2  ;;  %1236 = vmatpush.bf16.msra.mxu3 %v1173_v2 }
  0x45   : > { %452 = vmatpush.bf16.msra.mxu0 %v1172_v3  ;;  %1237 = vmatpush.bf16.msra.mxu1 %v1172_v3 }
  0x46   : > { %1238 = vmatpush.bf16.msra.mxu2 %v1172_v3  ;;  %1239 = vmatpush.bf16.msra.mxu3 %v1172_v3 }
  0x49   : > { %453 = vmatpush.bf16.msra.mxu0 %v1171_v4  ;;  %1240 = vmatpush.bf16.msra.mxu1 %v1171_v4 }
  0x4a   : > { %1241 = vmatpush.bf16.msra.mxu2 %v1171_v4  ;;  %1242 = vmatpush.bf16.msra.mxu3 %v1171_v4 }
  0x4d   : > { %454 = vmatpush.bf16.msra.mxu0 %v1170_v5  ;;  %1243 = vmatpush.bf16.msra.mxu1 %v1170_v5 }
  0x4e   : > { %1244 = vmatpush.bf16.msra.mxu2 %v1170_v5  ;;  %1245 = vmatpush.bf16.msra.mxu3 %v1170_v5 }
  0x51   : > { %455 = vmatpush.bf16.msra.mxu0 %v1169_v6  ;;  %1246 = vmatpush.bf16.msra.mxu1 %v1169_v6 }
  0x52   : > { %1247 = vmatpush.bf16.msra.mxu2 %v1169_v6  ;;  %1248 = vmatpush.bf16.msra.mxu3 %v1169_v6 }
  0x55   : > { %456 = vmatpush.bf16.msra.mxu0 %v1168_v7  ;;  %1249 = vmatpush.bf16.msra.mxu1 %v1168_v7 }
  0x56   : > { %1250 = vmatpush.bf16.msra.mxu2 %v1168_v7  ;;  %1251 = vmatpush.bf16.msra.mxu3 %v1168_v7 }
  0x58   : > { %457 = vmatmul.bf16.vlgmr.msra.gmra.mxu0 %v1164_v8  ;;  %462 = vmatmul.bf16.vlgmr.msra.gmra.mxu1 %v1165_v9 }
  0x59   : > { %467 = vmatmul.bf16.vlgmr.msra.gmra.mxu2 %v1166_v10  ;;  %472 = vmatmul.bf16.vlgmr.msra.gmra.mxu3 %v1167_v11 }
  0xd5   : > { %v458_v12 = vpop.f32.mrf.mxu0  ;;  %v463_v13 = vpop.f32.mrf.mxu1 }
  0xd6   : > { %v459_v15 = vadd.f32 %v1376_v14, %v458_v12  ;;  %v464_v16 = vadd.f32 %v1376_v14, %v463_v13 }
  0xd8   : > { %v478_v23 = vmax.f32 %v459_v15, 0.0  ;;  %v480_v24 = vmax.f32 %v464_v16, 0.0 }
  0xdc   : > { %v468_v17 = vpop.f32.mrf.mxu2  ;;  %v473_v18 = vpop.f32.mrf.mxu3 }
  0xdd   : > { %v460_v19 = vpop.f32.mrf.mxu0  ;;  %v465_v20 = vpop.f32.mrf.mxu1  ;;  %v469_v29 = vadd.f32 %v1376_v14, %v468_v17  ;;  %v474_v30 = vadd.f32 %v1376_v14, %v473_v18 }
  0xde   : > { %v461_v21 = vadd.f32 %v1376_v14, %v460_v19  ;;  %v466_v22 = vadd.f32 %v1376_v14, %v465_v20 }
  0xdf   : > { %v482_v35 = vmax.f32 %v469_v29, 0.0  ;;  %v484_v36 = vmax.f32 %v474_v30, 0.0 }
  0xe0   : > { %v479_v25 = vmax.f32 %v461_v21, 0.0  ;;  %v481_v26 = vmax.f32 %v466_v22, 0.0 }
  0xe2   : > { %v1208_v27 = vpack.c.bf16 %v479_v25, %v478_v23  ;;  %v1213_v28 = vpack.c.bf16 %v481_v26, %v480_v24 }
  0xe4   : > { %1209 = vst [vmem:[%s495_s13] sm:$0xff] %v1208_v27   ;;  %v470_v31 = vpop.f32.mrf.mxu2  ;;  %v475_v32 = vpop.f32.mrf.mxu3 }
  0xe5   : > { %1225 = vst [vmem:[%s495_s13 + $0x8] sm:$0xff] %v1213_v28   ;;  %v471_v33 = vadd.f32 %v1376_v14, %v470_v31  ;;  %v476_v34 = vadd.f32 %v1376_v14, %v475_v32 }
  0xe7   : > { %v483_v37 = vmax.f32 %v471_v33, 0.0  ;;  %v485_v38 = vmax.f32 %v476_v34, 0.0 }
  0xe9   : > { %v1218_v39 = vpack.c.bf16 %v483_v37, %v482_v35  ;;  %v1223_v40 = vpack.c.bf16 %v485_v38, %v484_v36 }
  0xeb   : > { %1226 = vst [vmem:[%s495_s13 + $0x10] sm:$0xff] %v1218_v39  }
  0xec   : > { %1227 = vst [vmem:[%s495_s13 + $0x18] sm:$0xff] %v1223_v40  }
  0xed PF: > { %p1045_p2 = scmp.ne.s32.totalorder %s1593_s28, 1 }
  0xee   : > { %s508_s17 = sshra.s32 (!%p1045_p2), %s993_s26, 3 }
  0xef   : > { %507 = sbr.rel (%p1045_p2) target bundleno = 743 (0x2e7), region = 72  ;;  %s1046_s14 = sshll.u32 (!%p1045_p2), %s508_s17, 2 }
  0xf0   : > { %s511_s22 = scalar_lea.vmem (!%p1045_p2), [#allocation3], %s1046_s14 }
  0xf4   : > { %v1187_v41 = vld [vmem:[#allocation2 + $0x38] sm:$0xff]  ;;  %v1186_v42 = vld [vmem:[#allocation2 + $0x30] sm:$0xff]  ;;  %v1185_v43 = vld [vmem:[#allocation2 + $0x28] sm:$0xff] }
  0xf5   : > { %608 = vmatpush.bf16.msra.mxu0 %v1187_v41  ;;  %1252 = vmatpush.bf16.msra.mxu3 %v1187_v41  ;;  %v1184_v44 = vld [vmem:[#allocation2 + $0x20] sm:$0xff]  ;;  %v1183_v45 = vld [vmem:[#allocation2 + $0x18] sm:$0xff]  ;;  %v1182_v46 = vld [vmem:[#allocation2 + $0x10] sm:$0xff] }
  0xf6   : > { %v1181_v47 = vld [vmem:[#allocation2 + $0x8] sm:$0xff]  ;;  %v1180_v48 = vld [vmem:[#allocation2] sm:$0xff]  ;;  %v1195_v51 = vld [vmem:[#allocation8 + $0x38] sm:$0xff] }
  0xf7   : > { %v1176_v49 = vld [vmem:[%s511_s22] sm:$0xff]  ;;  %v1177_v50 = vld [vmem:[%s511_s22 + $0x8] sm:$0xff]  ;;  %709 = vmatpush.bf16.msra.mxu1 %v1195_v51  ;;  %v1194_v52 = vld [vmem:[#allocation8 + $0x30] sm:$0xff] }
  0xf8   : > { %v1193_v53 = vld [vmem:[#allocation8 + $0x28] sm:$0xff]  ;;  %v1192_v54 = vld [vmem:[#allocation8 + $0x20] sm:$0xff]  ;;  %v1178_v55 = vld [vmem:[%s511_s22 + $0x10] sm:$0xff] }
  0xf9   : > { %609 = vmatpush.bf16.msra.mxu0 %v1186_v42  ;;  %1253 = vmatpush.bf16.msra.mxu3 %v1186_v42  ;;  %v1191_v56 = vld [vmem:[#allocation8 + $0x18] sm:$0xff]  ;;  %v1190_v58 = vld [vmem:[#allocation8 + $0x10] sm:$0xff]  ;;  %v1189_v59 = vld [vmem:[#allocation8 + $0x8] sm:$0xff] }
  0xfa   : > { %v1179_v57 = vld [vmem:[%s511_s22 + $0x18] sm:$0xff]  ;;  %v1188_v60 = vld [vmem:[#allocation8] sm:$0xff]  ;;  %v1202_v5 = vld [vmem:[#allocation9 + $0x30] sm:$0xff] }
  0xfb   : > { %710 = vmatpush.bf16.msra.mxu1 %v1194_v52  ;;  %v1203_v4 = vld [vmem:[#allocation9 + $0x38] sm:$0xff]  ;;  %v1201_v6 = vld [vmem:[#allocation9 + $0x28] sm:$0xff]  ;;  %v1200_v8 = vld [vmem:[#allocation9 + $0x20] sm:$0xff] }
  0xfc   : > { %818 = vmatpush.bf16.msra.mxu2 %v1203_v4  ;;  %v1199_v13 = vld [vmem:[#allocation9 + $0x18] sm:$0xff]  ;;  %v1198_v14 = vld [vmem:[#allocation9 + $0x10] sm:$0xff]  ;;  %v1197_v15 = vld [vmem:[#allocation9 + $0x8] sm:$0xff] }
  0xfd   : > { %610 = vmatpush.bf16.msra.mxu0 %v1185_v43  ;;  %1254 = vmatpush.bf16.msra.mxu3 %v1185_v43  ;;  %v1196_v16 = vld [vmem:[#allocation9] sm:$0xff] }
  0xfe   : > { %v1377_v18 = vld [vmem:[%s1862_s4] ss:$0 sm:$0xff] }
  0xff   : > { %711 = vmatpush.bf16.msra.mxu1 %v1193_v53 }
 0x100   : > { %819 = vmatpush.bf16.msra.mxu2 %v1202_v5 }
 0x101   : > { %611 = vmatpush.bf16.msra.mxu0 %v1184_v44  ;;  %1255 = vmatpush.bf16.msra.mxu3 %v1184_v44 }
 0x103   : > { %712 = vmatpush.bf16.msra.mxu1 %v1192_v54 }
 0x104   : > { %820 = vmatpush.bf16.msra.mxu2 %v1201_v6 }
 0x105   : > { %612 = vmatpush.bf16.msra.mxu0 %v1183_v45  ;;  %1256 = vmatpush.bf16.msra.mxu3 %v1183_v45 }
 0x107   : > { %713 = vmatpush.bf16.msra.mxu1 %v1191_v56 }
 0x108   : > { %821 = vmatpush.bf16.msra.mxu2 %v1200_v8 }
 0x109   : > { %613 = vmatpush.bf16.msra.mxu0 %v1182_v46  ;;  %1257 = vmatpush.bf16.msra.mxu3 %v1182_v46  ;;  %v1378_v46 = vld [vmem:[%s1864_s6] ss:$0 sm:$0xff] }
 0x10b   : > { %714 = vmatpush.bf16.msra.mxu1 %v1190_v58 }
 0x10c   : > { %822 = vmatpush.bf16.msra.mxu2 %v1199_v13 }
 0x10d   : > { %614 = vmatpush.bf16.msra.mxu0 %v1181_v47  ;;  %1258 = vmatpush.bf16.msra.mxu3 %v1181_v47 }
 0x10f   : > { %715 = vmatpush.bf16.msra.mxu1 %v1189_v59 }
 0x110   : > { %823 = vmatpush.bf16.msra.mxu2 %v1198_v14 }
 0x111   : > { %615 = vmatpush.bf16.msra.mxu0 %v1180_v48  ;;  %1259 = vmatpush.bf16.msra.mxu3 %v1180_v48 }
 0x113   : > { %716 = vmatpush.bf16.msra.mxu1 %v1188_v60 }
 0x114   : > { %616 = vmatmul.bf16.vlgmr.msra.gmra.mxu0 %v1176_v49  ;;  %621 = vmatmul.bf16.vlgmr.msra.gmra.mxu3 %v1177_v50 }
 0x115   : > { %824 = vmatpush.bf16.msra.mxu2 %v1197_v15 }
 0x119   : > { %825 = vmatpush.bf16.msra.mxu2 %v1196_v16 }
 0x124   : > { %626 = vmatmul.bf16.gmra.mxu3 %v1178_v55 }
 0x134   : > { %631 = vmatmul.bf16.gmra.mxu3 %v1179_v57 }
 0x191   : > { %v617_v61 = vpop.f32.mrf.mxu0 }
 0x197   : > { %v622_v62 = vpop.f32.mrf.mxu3 }
 0x199   : > { %v619_v63 = vpop.f32.mrf.mxu0 }
 0x19a   : > { %v637_v0 = vpack.c.bf16 %v619_v63, %v617_v61 }
 0x19c   : > { %717 = vmatmul.bf16.vlgmr.msra.gmra.mxu1 %v637_v0 }
 0x19f   : > { %v624_v1 = vpop.f32.mrf.mxu3 }
 0x1a0   : > { %v638_v3 = vpack.c.bf16 %v624_v1, %v622_v62 }
 0x1a7   : > { %v627_v2 = vpop.f32.mrf.mxu3 }
 0x1ac   : > { %722 = vmatmul.bf16.gmra.mxu1 %v638_v3 }
 0x1af   : > { %v629_v7 = vpop.f32.mrf.mxu3 }
 0x1b0   : > { %v639_v9 = vpack.c.bf16 %v629_v7, %v627_v2 }
 0x1b7   : > { %v632_v10 = vpop.f32.mrf.mxu3 }
 0x1bc   : > { %727 = vmatmul.bf16.gmra.mxu1 %v639_v9 }
 0x1bf   : > { %v634_v11 = vpop.f32.mrf.mxu3 }
 0x1c0   : > { %v640_v12 = vpack.c.bf16 %v634_v11, %v632_v10 }
 0x1cc   : > { %732 = vmatmul.bf16.gmra.mxu1 %v640_v12 }
 0x219   : > { %v718_v17 = vpop.f32.mrf.mxu1 }
 0x21a   : > { %v719_v19 = vadd.f32 %v1377_v18, %v718_v17 }
 0x21c   : > { %v738_v22 = vmax.f32 %v719_v19, 0.0 }
 0x221   : > { %v720_v20 = vpop.f32.mrf.mxu1 }
 0x222   : > { %v721_v21 = vadd.f32 %v1377_v18, %v720_v20 }
 0x224   : > { %v739_v23 = vmax.f32 %v721_v21, 0.0 }
 0x226   : > { %v746_v24 = vpack.c.bf16 %v739_v23, %v738_v22 }
 0x228   : > { %826 = vmatmul.bf16.vlgmr.msra.gmra.mxu2 %v746_v24 }
 0x229   : > { %v723_v25 = vpop.f32.mrf.mxu1 }
 0x22a   : > { %v724_v26 = vadd.f32 %v1377_v18, %v723_v25 }
 0x22c   : > { %v740_v29 = vmax.f32 %v724_v26, 0.0 }
 0x231   : > { %v725_v27 = vpop.f32.mrf.mxu1 }
 0x232   : > { %v726_v28 = vadd.f32 %v1377_v18, %v725_v27 }
 0x234   : > { %v741_v30 = vmax.f32 %v726_v28, 0.0 }
 0x236   : > { %v747_v31 = vpack.c.bf16 %v741_v30, %v740_v29 }
 0x238   : > { %831 = vmatmul.bf16.gmra.mxu2 %v747_v31 }
 0x239   : > { %v728_v32 = vpop.f32.mrf.mxu1 }
 0x23a   : > { %v729_v33 = vadd.f32 %v1377_v18, %v728_v32 }
 0x23c   : > { %v742_v36 = vmax.f32 %v729_v33, 0.0 }
 0x241   : > { %v730_v34 = vpop.f32.mrf.mxu1 }
 0x242   : > { %v731_v35 = vadd.f32 %v1377_v18, %v730_v34 }
 0x244   : > { %v743_v37 = vmax.f32 %v731_v35, 0.0 }
 0x246   : > { %v748_v38 = vpack.c.bf16 %v743_v37, %v742_v36 }
 0x248   : > { %836 = vmatmul.bf16.gmra.mxu2 %v748_v38 }
 0x249   : > { %v733_v39 = vpop.f32.mrf.mxu1 }
 0x24a   : > { %v734_v40 = vadd.f32 %v1377_v18, %v733_v39 }
 0x24c   : > { %v744_v43 = vmax.f32 %v734_v40, 0.0 }
 0x251   : > { %v735_v41 = vpop.f32.mrf.mxu1 }
 0x252   : > { %v736_v42 = vadd.f32 %v1377_v18, %v735_v41 }
 0x254   : > { %v745_v44 = vmax.f32 %v736_v42, 0.0 }
 0x256   : > { %v749_v45 = vpack.c.bf16 %v745_v44, %v744_v43 }
 0x258   : > { %841 = vmatmul.bf16.gmra.mxu2 %v749_v45 }
 0x2ab   : > { %v827_v47 = vpop.f32.mrf.mxu2 }
 0x2ac   : > { %v828_v48 = vadd.f32 %v1378_v46, %v827_v47 }
 0x2ae   : > { %847 = vst [vmem:[%s1780_s30] sm:$0xff] %v828_v48 }
 0x2b3   : > { %v829_v49 = vpop.f32.mrf.mxu2 }
 0x2b4   : > { %v830_v50 = vadd.f32 %v1378_v46, %v829_v49 }
 0x2b6   : > { %848 = vst [vmem:[%s1780_s30 + $0x8] sm:$0xff] %v830_v50 }
 0x2bb   : > { %v832_v51 = vpop.f32.mrf.mxu2 }
 0x2bc   : > { %v833_v52 = vadd.f32 %v1378_v46, %v832_v51 }
 0x2be   : > { %849 = vst [vmem:[%s1780_s30 + $0x10] sm:$0xff] %v833_v52 }
 0x2c3   : > { %v834_v53 = vpop.f32.mrf.mxu2 }
 0x2c4   : > { %v835_v54 = vadd.f32 %v1378_v46, %v834_v53 }
 0x2c6   : > { %850 = vst [vmem:[%s1780_s30 + $0x18] sm:$0xff] %v835_v54 }
 0x2cb   : > { %v837_v55 = vpop.f32.mrf.mxu2 }
 0x2cc   : > { %v838_v56 = vadd.f32 %v1378_v46, %v837_v55 }
 0x2ce   : > { %851 = vst [vmem:[%s1780_s30 + $0x20] sm:$0xff] %v838_v56 }
 0x2d3   : > { %v839_v57 = vpop.f32.mrf.mxu2 }
 0x2d4   : > { %v840_v58 = vadd.f32 %v1378_v46, %v839_v57 }
 0x2d6   : > { %852 = vst [vmem:[%s1780_s30 + $0x28] sm:$0xff] %v840_v58 }
 0x2db   : > { %v842_v59 = vpop.f32.mrf.mxu2 }
 0x2dc   : > { %v843_v60 = vadd.f32 %v1378_v46, %v842_v59 }
 0x2de   : > { %853 = vst [vmem:[%s1780_s30 + $0x30] sm:$0xff] %v843_v60 }
 0x2e3   : > { %v844_v61 = vpop.f32.mrf.mxu2 }
 0x2e4   : > { %v845_v62 = vadd.f32 %v1378_v46, %v844_v61 }
 0x2e6   : > { %854 = vst [vmem:[%s1780_s30 + $0x38] sm:$0xff] %v845_v62 }
 0x2e7 PF: > { %s863_s21 = smul.u32 %s1589_s27, %s1593_s28  ;;  %s869_s26 = sshll.u32 %s1780_s30, 4  ;;  %s870_s26 = int_to_ptr.vmem [resolvable:$true] %s869_s26 }
 0x2e8   : > { %s856_s10 = scalar_lea.sflag [#allocation5], %s335_s1  ;;  %s1519_s28 = scalar_lea.hbm %s1865_s7, 128 }
 0x2e9   : > { %s1204_s29 = sshll.u32 %s863_s21, 6 }
 0x2ea   : > { %s868_s18 = scalar_lea.hbm %s1865_s7, %s1204_s29 }
 0x2eb   : > { %s871_s19 = sshll.u32 %s868_s18, 4  ;;  %s872_s19 = int_to_ptr.hbm [resolvable:$true] %s871_s19 }
 0x2ec   : > { %s1513_s13 = sshra.s32 %s872_s19, 4  ;;  %s1514_s13 = int_to_ptr.hbm [resolvable:$true] %s1513_s13 }
 0x2ed   : > { %s1515_s17 = scalar_lea.hbm %s1514_s13, 64  ;;  %p1520_p7 = scmp.lt.s32.totalorder %s1514_s13, %s1865_s7 }
 0x2ee   : > { %p1516_p3 = scmp.ne.s32.totalorder %s1514_s13, %s1515_s17  ;;  %p1521_p9 = scmp.lt.s32.totalorder %s1519_s28, %s1515_s17 }
 0x2f0   : > { %p1517_p4 = pnand %p1516_p3, %p1709_p6  ;;  %p1522_p10 = por %p1521_p9, %p1520_p7 }
 0x2f2   : > { %p1518_p5 = pneg %p1517_p4 }
 0x2f4   : > { %p1523_p11 = pnand %p1522_p10, %p1518_p5 }
 0x2f6   : > { %1526 = shalt.err (!%p1523_p11)
}
 0x2f7   : > { %s1613_s1 = smov 128   ;;  %s1614_s9 = smov 8  }
 0x2f8   : > { %1276 = dma.vmem_to_hbm [thread:$0]  (%p1709_p6), %s870_s26, 1024, %s872_s19, %s856_s10, %s1613_s1, %s1613_s1, %s1614_s9  }
 0x2f9 PF: > { %p1303_p12 = scmp.ge.s32.totalorder %s1605_s8, 2  ;;  %s886_s23 = sand.u32 1, %s1577_s24  }
 0x2fa   : > { %s887_s20 = scalar_lea.sflag [#allocation5], %s886_s23 }
 0x2fb   : > { %p1292_p13 = pnand %p1303_p12, %p1716_p8 }
 0x2fd   : > { %p1293_p0 = pneg %p1292_p13 }
 0x2ff   : > { %1572 = dma.done.wait (%p1293_p0), %s887_s20, 1024  }
 0x300   : > { %1574 = vsyncadd (%p1293_p0), %s887_s20, 4294966272  ;;  %s23_s8 = sadd.s32 1, %s1605_s8   ;;  %s1887_s21 = sld [smem:[#allocation16_spill]] }
 0x301   : > { %p20_p1 = scmp.ge.s32.totalorder %s23_s8, 6   ;;  %s1888_s26 = sld [smem:[#allocation22_spill]] }
 0x302   : > { %s1889_s27 = sld [smem:[#allocation17_spill]]  ;;  %s1893_s24 = smov %s1581_s25 }
 0x303   : > { %s1890_s28 = sld [smem:[#allocation18_spill]]  ;;  %22 = sbr.rel (!%p20_p1) target bundleno = 10 (0xa), region = 108 }
 0x304   : > { %s1891_s29 = sld [smem:[#allocation19_spill]] }
 0x305   : > { %s1892_s30 = sld [smem:[#allocation20_spill]] }
 0x306   : > { %s1894_s25 = smov %s1887_s21 }
 0x308   :  { %893 = vsyncpa [#allocation4], 1 }
 0x309   :  { %895 = vsyncpa [#allocation4 + $0x1], 1 }
 0x30a   :  { %896 = vsyncpa [#allocation7], 1 }
 0x30b   :  { %897 = vsyncpa [#allocation10], 1 }
 0x30c   :  { %898 = vsyncpa [#allocation5], 1 }
 0x30d   :  { %900 = vsyncpa [#allocation5 + $0x1], 1 }

</bundles_post_ra>
